<compile_context>
chip_gen: v7x
topology: tpu7x:2x2x1
jax: 0.10.0
libtpu: 0.0.40
codegen_flags: <defaults>
</compile_context>

<pallas_src>
import jax
import jax.numpy as jnp
from jax.experimental import pallas as pl
from jax.experimental.pallas import tpu as pltpu


def _round_up(n: int, m: int) -> int:
    return ((n + m - 1) // m) * m


def _make_preemphasis_kernel(coeff: float):
    coeff = float(coeff)  # weak-typed scalar: follows x's dtype

    def kernel(x_ref, prev_ref, o_ref):
        x = x_ref[...]                               # (tile_b, tile_t)
        # rolled[:, t] = x[:, t-1]; column 0 wraps within the tile (patched below).
        rolled = pltpu.roll(x, shift=1, axis=1)
        o_ref[...] = x - coeff * rolled
        # Column 0 of this time tile: previous sample comes from the boundary
        # input (reflect sample x[:, 1] for tile 0, x[:, j*tile_t - 1] otherwise).
        o_ref[:, 0:1] = x[:, 0:1] - coeff * prev_ref[:, 0:1]

    return kernel


def pre_emphasis(x: jnp.ndarray, coeff: float = 0.97, *,
                 max_tile_b: int = 64, max_tile_t: int = 16384,
                 vmem_per_buffer_bytes: int = 4 << 20) -> jnp.ndarray:
    """Pallas pre-emphasis filter. x: (B, T) -> (B, T), same dtype. Requires T >= 2."""
    B, T = x.shape
    if T < 2:
        raise ValueError("pre_emphasis requires T >= 2 (reflect pad needs one past sample)")

    itemsize = jnp.dtype(x.dtype).itemsize
    sub = 8 * max(1, 4 // itemsize)          # sublane packing: 8 f32, 16 bf16, 32 int8

    # --- batch tile: small, sublane-aligned; aim for >= 2 batch blocks (v7x TCs).
    if B <= sub:
        tile_b = B                           # single block == full dim (no alignment issue)
    else:
        tile_b = min(_round_up(B, sub), max(sub, max_tile_b))
        half = _round_up(-(-B // 2), sub)
        tile_b = max(sub, min(tile_b, half))

    # --- time tile: lane-dense, as big as the per-buffer VMEM budget allows.
    if T <= 128:
        tile_t = T                           # single block == full dim
    else:
        budget_t = (vmem_per_buffer_bytes // (tile_b * itemsize)) // 128 * 128
        cap = max(128, min((max_tile_t // 128) * 128, budget_t))
        tile_t = min(_round_up(T, 128), cap)

    grid_b = pl.cdiv(B, tile_b)
    grid_t = pl.cdiv(T, tile_t)
    n_t = grid_t

    # Previous-boundary-sample input: bounds[:, 0] = x[:, 1] (reflect),
    # bounds[:, j] = x[:, j*tile_t - 1] for j >= 1.  Lane-replicate each value
    # to a 128-wide column so the BlockSpec stays (8,128)-aligned.  Size is
    # B * n_t * 128 elements — negligible vs. the two full passes over x.
    tails = x[:, tile_t - 1:(n_t - 1) * tile_t:tile_t]        # (B, n_t - 1)
    bounds = jnp.concatenate([x[:, 1:2], tails], axis=1)      # (B, n_t)
    prev = jnp.broadcast_to(bounds[:, :, None], (B, n_t, 128)).reshape(B, n_t * 128)

    io_buf = tile_b * tile_t * itemsize
    prev_buf = tile_b * 128 * itemsize
    vmem_limit = int(4 * io_buf + 2 * prev_buf + (8 << 20))   # dbl-buffered I/O + slack

    out = pl.pallas_call(
        _make_preemphasis_kernel(coeff),
        out_shape=jax.ShapeDtypeStruct((B, T), x.dtype),
        grid_spec=pltpu.PrefetchScalarGridSpec(
            num_scalar_prefetch=0,
            grid=(grid_b, grid_t),
            in_specs=[
                pl.BlockSpec((tile_b, tile_t), lambda i, j: (i, j)),
                pl.BlockSpec((tile_b, 128), lambda i, j: (i, j)),
            ],
            out_specs=pl.BlockSpec((tile_b, tile_t), lambda i, j: (i, j)),
        ),
        compiler_params=pltpu.CompilerParams(
            dimension_semantics=("parallel", "parallel"),
            vmem_limit_bytes=vmem_limit),
    )(x, prev)
    return out


def pre_emphasis_ref(x: jnp.ndarray, coeff: float = 0.97) -> jnp.ndarray:
    """Pure-JAX reference mirroring the PyTorch module exactly."""
    padded = jnp.concatenate([x[:, 1:2], x], axis=1)          # reflect pad (1, 0)
    return padded[:, 1:] - coeff * padded[:, :-1]


if __name__ == "__main__":
    coeff = 0.97

    # Case 1: small, single-tile path (module-typical (B, T) waveform).
    x1 = jax.random.normal(jax.random.PRNGKey(0), (2, 128), dtype=jnp.float32)
    y1 = jax.block_until_ready(pre_emphasis(x1, coeff))
    assert y1.shape == (2, 128) and y1.dtype == jnp.float32
    assert jnp.allclose(y1, pre_emphasis_ref(x1, coeff), atol=1e-6, rtol=1e-6), "case 1 mismatch"

    # Case 2: ragged batch + ragged time edge, NO wrapper padding (default tiles).
    x2 = jax.random.normal(jax.random.PRNGKey(0), (20, 500), dtype=jnp.float32)
    y2 = jax.block_until_ready(pre_emphasis(x2, coeff))
    assert y2.shape == (20, 500)
    assert jnp.allclose(y2, pre_emphasis_ref(x2, coeff), atol=1e-6, rtol=1e-6), "case 2 mismatch"

    # Case 3: multiple time tiles + ragged edges on both axes (small tile caps).
    x3 = jax.random.normal(jax.random.PRNGKey(0), (20, 2000), dtype=jnp.float32)
    y3 = jax.block_until_ready(pre_emphasis(x3, coeff, max_tile_b=8, max_tile_t=256))
    assert y3.shape == (20, 2000)
    assert jnp.allclose(y3, pre_emphasis_ref(x3, coeff), atol=1e-6, rtol=1e-6), "case 3 mismatch"

    # Case 4: bf16 input (16-row sublane packing path), tolerance per bf16 precision.
    x4 = jax.random.normal(jax.random.PRNGKey(0), (4, 384), dtype=jnp.bfloat16)
    y4 = jax.block_until_ready(pre_emphasis(x4, coeff))
    assert y4.shape == (4, 384) and y4.dtype == jnp.bfloat16
    assert jnp.allclose(y4.astype(jnp.float32),
                        pre_emphasis_ref(x4, coeff).astype(jnp.float32),
                        atol=2e-2, rtol=2e-2), "case 4 mismatch"

    print("KERNEL_OK")
</pallas_src>

<mosaic_0001>
module attributes {stable_mosaic.version = 11 : i64} {
  func.func @kernel(%arg0: i32, %arg1: i32, %arg2: memref<2x128xf32, #tpu.memory_space<vmem>>, %arg3: memref<2x128xf32, #tpu.memory_space<vmem>>, %arg4: memref<2x128xf32, #tpu.memory_space<vmem>>) attributes {dimension_semantics = [#tpu.dimension_semantics<parallel>, #tpu.dimension_semantics<parallel>], iteration_bounds = array<i64: 1, 1>, scalar_prefetch = 0 : i64, scratch_operands = 0 : i64, tpu.core_type = #tpu.core_type<tc>, window_params = [{transform_indices = @transform_0, window_bounds = array<i64: 2, 128>}, {transform_indices = @transform_1, window_bounds = array<i64: 2, 128>}, {transform_indices = @transform_2, window_bounds = array<i64: 2, 128>}]} {
    %c0 = arith.constant 0 : index
    %c0_0 = arith.constant 0 : index
    %0 = vector.load %arg2[%c0, %c0_0] : memref<2x128xf32, #tpu.memory_space<vmem>>, vector<2x128xf32>
    %c1_i32 = arith.constant 1 : i32
    %1 = tpu.dynamic_rotate %0 by %c1_i32 dim 1 : vector<2x128xf32>, i32 -> vector<2x128xf32>
    %cst = arith.constant 9.700000e-01 : f32
    %2 = vector.broadcast %cst : f32 to vector<2x128xf32>
    %3 = arith.mulf %2, %1 : vector<2x128xf32>
    %4 = arith.subf %0, %3 : vector<2x128xf32>
    %c0_1 = arith.constant 0 : index
    %c0_2 = arith.constant 0 : index
    %5 = vector.load %arg4[%c0_1, %c0_2] : memref<2x128xf32, #tpu.memory_space<vmem>>, vector<2x128xf32>
    tpu.vector_store %arg4[%c0_1, %c0_2], %4 {strides = array<i32>} : memref<2x128xf32, #tpu.memory_space<vmem>>, vector<2x128xf32>,
    %6 = vector.extract_strided_slice %0 {offsets = [0, 0], sizes = [2, 1], strides = [1, 1]} : vector<2x128xf32> to vector<2x1xf32>
    %c0_3 = arith.constant 0 : index
    %c0_4 = arith.constant 0 : index
    %7 = vector.load %arg3[%c0_3, %c0_4] : memref<2x128xf32, #tpu.memory_space<vmem>>, vector<2x1xf32>
    %cst_5 = arith.constant 9.700000e-01 : f32
    %8 = vector.broadcast %cst_5 : f32 to vector<2x1xf32>
    %9 = arith.mulf %8, %7 : vector<2x1xf32>
    %10 = arith.subf %6, %9 : vector<2x1xf32>
    %c0_6 = arith.constant 0 : index
    %c0_7 = arith.constant 0 : index
    %11 = vector.load %arg4[%c0_6, %c0_7] : memref<2x128xf32, #tpu.memory_space<vmem>>, vector<2x1xf32>
    tpu.vector_store %arg4[%c0_6, %c0_7], %10 {strides = array<i32>} : memref<2x128xf32, #tpu.memory_space<vmem>>, vector<2x1xf32>,
    return
  }
  func.func @transform_0(%arg0: i32, %arg1: i32) -> (i32, i32) {
    %c0_i32 = arith.constant 0 : i32
    return %arg0, %arg1 : i32, i32
  }
  func.func @transform_1(%arg0: i32, %arg1: i32) -> (i32, i32) {
    %c0_i32 = arith.constant 0 : i32
    return %arg0, %arg1 : i32, i32
  }
  func.func @transform_2(%arg0: i32, %arg1: i32) -> (i32, i32) {
    %c0_i32 = arith.constant 0 : i32
    return %arg0, %arg1 : i32, i32
  }
}

</mosaic_0001>

<bundles_post_ra>
// kernel: tpu_custom_call.1
= control target key start
LH: loop header
LB: loop body
LE: loop exit
PB: predicated region body
PF: predicated region fallthrough
CT: control target
= control target key end

     0   :  { %7 = vsyncpa [#allocation3], 0  ;;  %s146_s0 = inlined_call_operand.hbm [shape: f32[2,128], index: 0, kind: input, shape index: {}]   ;;  %s147_s1 = inlined_call_operand.vmem [shape: f32[2,128], index: 1, kind: input, shape index: {}]   ;;  %s148_s2 = inlined_call_operand.hbm [shape: f32[2,128], index: 2, kind: output, shape index: {}]  }
   0x1   :  { %8 = vsyncpa [#allocation4], 0  ;;  %s101_s9 = smov [#allocation2]   ;;  %s53_s13 = scalar_lea.hbm %s146_s0, 32 }
   0x2   :  { %s15_s10 = sshll.u32 %s101_s9, 4  ;;  %p54_p0 = scmp.ne.s32.totalorder %s146_s0, %s53_s13  ;;  %s16_s10 = int_to_ptr.vmem [resolvable:$true] %s15_s10 }
   0x3   :  { %p57_p1 = scmp.lt.u32.totalorder %s53_s13, %s146_s0 }
   0x5   :  { %p59_p2 = pnand %p57_p1, %p54_p0 }
   0x7   :  { %62 = shalt.err (!%p59_p2)
}
   0x8   :  { %s63_s18 = scalar_lea.vmem %s16_s10, 32  ;;  %p68_p4 = scmp.lt.s32.totalorder %s16_s10, %s16_s10 }
   0x9   :  { %p64_p3 = scmp.ne.s32.totalorder %s16_s10, %s63_s18  ;;  %p69_p5 = scmp.lt.s32.totalorder %s63_s18, %s63_s18 }
   0xb   :  { %p70_p6 = por %p69_p5, %p68_p4 }
   0xd   :  { %p71_p7 = pnand %p70_p6, %p64_p3 }
   0xf   :  { %74 = shalt.err (!%p71_p7)
}
  0x10   :  { %18 = dma.hbm_to_vmem [thread:$0]  %s146_s0, 32, %s16_s10, [#allocation3]  }
  0x11   :  { %97 = dma.done.wait [#allocation3], 32  }
  0x12   :  { %98 = vsyncadd [#allocation3], 4294967264  ;;  %v24_v0 = vld [vmem:[#allocation2] sm:$0x3]  ;;  %s102_s21 = smov 1   ;;  %s103_s24 = smov [#allocation5]  }
  0x13   :  { %25 = vrot.lane.b32.xlu0 %v24_v0, %s102_s21  ;;  %v30_v1 = vld [vmem:[%s147_s1] sm:$0x3]  ;;  %s41_s25 = sshll.u32 %s103_s24, 4  ;;  %vm33_vm0 = vcmask 1024   ;;  %s42_s25 = int_to_ptr.vmem [resolvable:$true] %s41_s25 }
  0x14   :  { %v31_v2 = vmul.f32 0.97, %v30_v1  ;;  %s75_s0 = scalar_lea.vmem %s42_s25, 32  ;;  %p80_p9 = scmp.lt.s32.totalorder %s42_s25, %s42_s25 }
  0x15   :  { %p76_p8 = scmp.ne.s32.totalorder %s42_s25, %s75_s0  ;;  %p81_p10 = scmp.lt.s32.totalorder %s75_s0, %s75_s0 }
  0x16   :  { %v32_v5 = vsub.f32 %v24_v0, %v31_v2 }
  0x17   :  { %p82_p11 = por %p81_p10, %p80_p9 }
  0x19   :  { %p83_p12 = pnand %p82_p11, %p76_p8 }
  0x85   :  { %v26_v3 = vpop.permute.xlu0 %25 }
  0x86   :  { %v27_v4 = vmul.f32 0.97, %v26_v3 }
  0x88   :  { %v28_v6 = vsub.f32 %v24_v0, %v27_v4 }
  0x8a   :  { %29 = vst [vmem:[#allocation5] sm:$0x3] %v28_v6 }
  0x8b   :  { %34 = vst.msk [vmem:[#allocation5] sm:$0x3] %vm33_vm0, %v32_v5 }
  0x8c   :  { %86 = shalt.err (!%p83_p12)
}
  0x8d   :  { %s87_s27 = scalar_lea.hbm %s148_s2, 32 }
  0x8e   :  { %p88_p13 = scmp.ne.s32.totalorder %s148_s2, %s87_s27  ;;  %p91_p0 = scmp.lt.u32.totalorder %s87_s27, %s148_s2 }
  0x90   :  { %p93_p1 = pnand %p91_p0, %p88_p13 }
  0x92   :  { %96 = shalt.err (!%p93_p1)
}
  0x93   :  { %44 = dma.vmem_to_hbm [thread:$0]  %s42_s25, 32, %s148_s2, [#allocation4]  }
  0x94   :  { %99 = dma.done.wait [#allocation4], 32  }
  0x95   :  { %100 = vsyncadd [#allocation4], 4294967264 }
  0x96   :  { %48 = vsyncpa [#allocation3], 1 }
  0x97   :  { %49 = vsyncpa [#allocation4], 1 }

</bundles_post_ra>
